<compile_context>
chip_gen: v7x
topology: tpu7x:2x2x1
jax: 0.10.0
libtpu: 0.0.40
codegen_flags: <defaults>
</compile_context>

<pallas_src>
import jax
import jax.numpy as jnp
from jax import lax
from jax.experimental import pallas as pl
from jax.experimental.pallas import tpu as pltpu

_LANE = 128


def _head_gemm_kernel(lhs_ref, w_ref, o_ref):
    # lhs_ref: (rows_tile, K)        im2col rows (+ ones column for the bias)
    # w_ref:   (K, Cout_pad)         fused cls|reg weights (+ bias row), lane-padded
    # o_ref:   (rows_tile, Cout_pad) lane-dense output tile
    o_ref[...] = jnp.dot(
        lhs_ref[...], w_ref[...], preferred_element_type=jnp.float32
    )


def fused_head_conv3x3(x_nchw, w_cls, b_cls, w_reg, b_reg):
    """Fused cls+reg 3x3 stride-1 pad-1 conv heads for one feature level.

    Returns (cls_flat, reg_flat), each (B, H*W*head_channels) in PyTorch's
    permute(0, 2, 3, 1).reshape(B, -1) flattening order.
    """
    B, Cin, H, W = x_nchw.shape
    c_cls = w_cls.shape[0]
    c_reg = w_reg.shape[0]
    c_fused = c_cls + c_reg
    c_pad = ((c_fused + _LANE - 1) // _LANE) * _LANE   # lane-dense output width
    rows = B * H * W
    K = 9 * Cin + 1                                    # +1 row for folded bias

    # ---- wrapper glue (once per level, shared by both heads) ---------------
    # NCHW -> NHWC, zero-pad the halo, im2col the 9 taps along the channel dim.
    x_nhwc = jnp.transpose(x_nchw, (0, 2, 3, 1)).astype(jnp.float32)
    x_pad = jnp.pad(x_nhwc, ((0, 0), (1, 1), (1, 1), (0, 0)))
    taps = [
        x_pad[:, ky:ky + H, kx:kx + W, :]
        for ky in range(3)
        for kx in range(3)
    ]
    patches = jnp.concatenate(taps, axis=-1).reshape(rows, 9 * Cin)
    lhs = jnp.concatenate(
        [patches, jnp.ones((rows, 1), jnp.float32)], axis=-1
    )  # (rows, K)

    # Fused RHS: (Cout_fused, Cin, 3, 3) -> (9*Cin, Cout_fused) tap-major, with
    # the bias folded in as one extra row and the channel dim zero-padded to a
    # multiple of 128 so the kernel's stores are unmasked / lane-dense.
    w_fused = jnp.concatenate([w_cls, w_reg], axis=0)
    b_fused = jnp.concatenate([b_cls, b_reg], axis=0)
    w_mat = jnp.transpose(w_fused, (2, 3, 1, 0)).reshape(9 * Cin, c_fused)
    w_mat = jnp.concatenate([w_mat, b_fused[None, :]], axis=0)      # (K, Cf)
    w_mat = jnp.pad(w_mat, ((0, 0), (0, c_pad - c_fused)))          # (K, Cp)

    # ---- grid: split rows into 2 'parallel' tiles (keeps both v7x TCs busy;
    #      negligible extra loop overhead on the single-TC v5e/v6e) ----------
    if rows % 16 == 0:
        rows_tile, n_tiles = rows // 2, 2
    else:
        rows_tile, n_tiles = rows, 1

    cost = pl.CostEstimate(
        flops=2 * rows * K * c_pad,
        transcendentals=0,
        bytes_accessed=4 * (rows * K + K * c_pad + rows * c_pad),
    )

    out = pl.pallas_call(
        _head_gemm_kernel,
        out_shape=jax.ShapeDtypeStruct((rows, c_pad), jnp.float32),
        grid=(n_tiles,),
        in_specs=[
            pl.BlockSpec((rows_tile, K), lambda i: (i, 0)),
            pl.BlockSpec((K, c_pad), lambda i: (0, 0)),
        ],
        out_specs=pl.BlockSpec((rows_tile, c_pad), lambda i: (i, 0)),
        compiler_params=pltpu.CompilerParams(
            dimension_semantics=("parallel",),
        ),
        cost_estimate=cost,
    )(lhs, w_mat)

    # Slice the lane padding off BEFORE flattening so anchor ordering and the
    # downstream concat offsets stay exactly as in PyTorch.
    out = out[:, :c_fused].reshape(B, H * W, c_fused)
    cls_flat = out[:, :, :c_cls].reshape(B, -1)
    reg_flat = out[:, :, c_cls:].reshape(B, -1)
    return cls_flat, reg_flat


def _xavier_uniform(key, shape):
    # shape = (Cout, Cin, kh, kw), matching torch.nn.Conv2d.weight
    fan_out = shape[0] * shape[2] * shape[3]
    fan_in = shape[1] * shape[2] * shape[3]
    bound = (6.0 / (fan_in + fan_out)) ** 0.5
    return jax.random.uniform(key, shape, jnp.float32, -bound, bound)


class BoxPredictorPallas:
    """JAX/Pallas equivalent of BoxPredictor with SSD conv heads."""

    def __init__(self, key, boxes_per_location, out_channels, num_categories):
        self.num_categories = num_categories
        self.cls_params = []
        self.reg_params = []
        keys = jax.random.split(key, 2 * len(out_channels))
        for i, (num_boxes, num_channels) in enumerate(
            zip(boxes_per_location, out_channels)
        ):
            wc = _xavier_uniform(
                keys[2 * i], (num_boxes * num_categories, num_channels, 3, 3)
            )
            bc = jnp.zeros((num_boxes * num_categories,), jnp.float32)
            wr = _xavier_uniform(
                keys[2 * i + 1], (num_boxes * 4, num_channels, 3, 3)
            )
            br = jnp.zeros((num_boxes * 4,), jnp.float32)
            self.cls_params.append((wc, bc))
            self.reg_params.append((wr, br))
        # TODO(synk): for realistic SSD channel widths (256-1024) cast the GEMM
        # operands to bf16 on v6e/v7x and re-derive row tiling vs 64 MiB VMEM.

    def __call__(self, features):
        batch_size = features[0].shape[0]
        cls_flat, reg_flat = [], []
        for feat, (wc, bc), (wr, br) in zip(
            features, self.cls_params, self.reg_params
        ):
            c, r = fused_head_conv3x3(feat, wc, bc, wr, br)
            cls_flat.append(c)
            reg_flat.append(r)
        cls_logits = jnp.concatenate(cls_flat, axis=1).reshape(
            batch_size, -1, self.num_categories
        )
        bbox_pred = jnp.concatenate(reg_flat, axis=1).reshape(batch_size, -1, 4)
        return cls_logits, bbox_pred


if __name__ == "__main__":
    key = jax.random.PRNGKey(0)
    k_params, k_f1, k_f2 = jax.random.split(key, 3)

    boxes_per_location = (4, 6)
    out_channels = (4, 8)
    num_categories = 3

    predictor = BoxPredictorPallas(
        k_params, boxes_per_location, out_channels, num_categories
    )

    # Two feature levels, NCHW (as the PyTorch module expects).
    features = [
        jax.random.normal(k_f1, (2, 4, 8, 8), jnp.float32),
        jax.random.normal(k_f2, (2, 8, 4, 4), jnp.float32),
    ]

    cls_logits, bbox_pred = predictor(features)
    jax.block_until_ready((cls_logits, bbox_pred))

    # Pure-JAX reference (lax conv) reproducing the PyTorch forward semantics.
    def ref_conv(x, w, b):
        y = lax.conv_general_dilated(
            x, w, (1, 1), ((1, 1), (1, 1)),
            dimension_numbers=("NCHW", "OIHW", "NCHW"),
        )
        return y + b[None, :, None, None]

    B = features[0].shape[0]
    cls_r, reg_r = [], []
    for feat, (wc, bc), (wr, br) in zip(
        features, predictor.cls_params, predictor.reg_params
    ):
        c = jnp.transpose(ref_conv(feat, wc, bc), (0, 2, 3, 1)).reshape(B, -1)
        r = jnp.transpose(ref_conv(feat, wr, br), (0, 2, 3, 1)).reshape(B, -1)
        cls_r.append(c)
        reg_r.append(r)
    cls_ref = jnp.concatenate(cls_r, axis=1).reshape(B, -1, num_categories)
    reg_ref = jnp.concatenate(reg_r, axis=1).reshape(B, -1, 4)

    # total anchors = 8*8*4 + 4*4*6 = 352
    assert cls_logits.shape == (2, 352, num_categories), cls_logits.shape
    assert bbox_pred.shape == (2, 352, 4), bbox_pred.shape
    assert jnp.allclose(cls_logits, cls_ref, atol=1e-4, rtol=1e-4)
    assert jnp.allclose(bbox_pred, reg_ref, atol=1e-4, rtol=1e-4)

    print("KERNEL_OK")
</pallas_src>

<mosaic_0001>
module attributes {stable_mosaic.version = 11 : i64} {
  func.func @_head_gemm_kernel(%arg0: i32, %arg1: memref<64x37xf32, #tpu.memory_space<vmem>>, %arg2: memref<37x128xf32, #tpu.memory_space<vmem>>, %arg3: memref<64x128xf32, #tpu.memory_space<vmem>>) attributes {dimension_semantics = [#tpu.dimension_semantics<parallel>], iteration_bounds = array<i64: 2>, scalar_prefetch = 0 : i64, scratch_operands = 0 : i64, tpu.core_type = #tpu.core_type<tc>, window_params = [{transform_indices = @transform_0, window_bounds = array<i64: 64, 37>}, {pipeline_mode = #tpu.pipeline_mode<synchronous>, transform_indices = @transform_1, window_bounds = array<i64: 37, 128>}, {transform_indices = @transform_2, window_bounds = array<i64: 64, 128>}]} {
    %c0 = arith.constant 0 : index
    %c0_0 = arith.constant 0 : index
    %0 = vector.load %arg1[%c0, %c0_0] : memref<64x37xf32, #tpu.memory_space<vmem>>, vector<64x37xf32>
    %c0_1 = arith.constant 0 : index
    %c0_2 = arith.constant 0 : index
    %1 = vector.load %arg2[%c0_1, %c0_2] : memref<37x128xf32, #tpu.memory_space<vmem>>, vector<37x128xf32>
    %cst = arith.constant dense<0.000000e+00> : vector<64x128xf32>
    %2 = tpu.matmul %0, %1, %cst {dimension_numbers = #tpu.dot_dimension_numbers<[1], [0], [0], [1], [0, 0, 1, 1], [], []>} : vector<64x37xf32>, vector<37x128xf32>, vector<64x128xf32> -> vector<64x128xf32>
    %c0_3 = arith.constant 0 : index
    %c0_4 = arith.constant 0 : index
    %3 = vector.load %arg3[%c0_3, %c0_4] : memref<64x128xf32, #tpu.memory_space<vmem>>, vector<64x128xf32>
    tpu.vector_store %arg3[%c0_3, %c0_4], %2 {strides = array<i32>} : memref<64x128xf32, #tpu.memory_space<vmem>>, vector<64x128xf32>,
    return
  }
  func.func @transform_0(%arg0: i32) -> (i32, i32) {
    %c0_i32 = arith.constant 0 : i32
    %c0_i32_0 = arith.constant 0 : i32
    return %arg0, %c0_i32 : i32, i32
  }
  func.func @transform_1(%arg0: i32) -> (i32, i32) {
    %c0_i32 = arith.constant 0 : i32
    %c0_i32_0 = arith.constant 0 : i32
    %c0_i32_1 = arith.constant 0 : i32
    return %c0_i32, %c0_i32_0 : i32, i32
  }
  func.func @transform_2(%arg0: i32) -> (i32, i32) {
    %c0_i32 = arith.constant 0 : i32
    %c0_i32_0 = arith.constant 0 : i32
    return %arg0, %c0_i32 : i32, i32
  }
}

</mosaic_0001>

<bundles_post_ra>
// kernel: tpu_custom_call.1
= control target key start
LH: loop header
LB: loop body
LE: loop exit
PB: predicated region body
PF: predicated region fallthrough
CT: control target
= control target key end

     0   :  { %7 = vsyncpa [#allocation3], 0  ;;  %s699_s0 = inlined_call_operand.vmem [shape: f32[128,37], index: 0, kind: input, shape index: {}]   ;;  %s700_s1 = inlined_call_operand.vmem [shape: f32[37,128], index: 1, kind: input, shape index: {}]   ;;  %s701_s2 = inlined_call_operand.hbm [shape: f32[128,128], index: 2, kind: output, shape index: {}]  }
   0x1   :  { %9 = vsyncpa [#allocation3 + $0x1], 0  ;;  %s570_s9 = smov 0   ;;  %s572_s10 = smov 0  }
   0x2   :  { %s574_s11 = smov 0   ;;  %s576_s12 = smov 0  }
   0x3 LB: > { %s591_s13 = sadd.s32 4294967295, %s550_s12   ;;  %s376_s14 = sadd.s32 4294967294, %s550_s12   ;;  %s550_s12 = sphi %s576_s12, %s707_s12   ;;  %s546_s11 = sphi %s574_s11, %s706_s11   ;;  %s542_s10 = sphi %s572_s10, %s705_s10   ;;  %s538_s9 = sphi %s570_s9, %s704_s9  }
   0x4   : > { %s595_s15 = sadd.s32 1, %s550_s12   ;;  %s69_s16 = sadd.s32 1, %s546_s11 }
   0x5   : > { %s66_s17 = ssub.s32 %s550_s12, %s595_s15  ;;  %p79_p0 = scmp.ne.s32.totalorder %s546_s11, %s542_s10 }
   0x6   : > { %p67_p1 = scmp.eq.s32.totalorder %s66_s17, 0  ;;  %p80_p2 = scmp.eq.s32.totalorder %s591_s13, 1 }
   0x7   : > { %p85_p3 = scmp.ne.s32.totalorder %s542_s10, %s538_s9  ;;  %p86_p4 = scmp.eq.s32.totalorder %s376_s14, 1 }
   0x8   : > { %s606_s18 = scalar_select %p67_p1, %s546_s11, %s69_s16  }
   0x9   : > { %p608_p5 = por %p80_p2, %p79_p0  ;;  %p612_p6 = por %p86_p4, %p85_p3 }
   0xa   : > { %p379_p7 = scmp.ge.s32.totalorder %s550_s12, 1  ;;  %p116_p8 = scmp.lt.s32.totalorder %s550_s12, 3 }
   0xc   : > { %p117_p9 = pnand %p379_p7, %p116_p8 }
   0xd   : > { %v153_v0 = vld [vmem:[%s700_s1] sm:$0xff] (!%p117_p9)  ;;  %v154_v1 = vld [vmem:[%s700_s1 + $0x8] sm:$0xff] (!%p117_p9)  ;;  %v155_v2 = vld [vmem:[%s700_s1 + $0x10] sm:$0xff] (!%p117_p9)  ;;  %s381_s27 = sshll.u32 (!%p117_p9), %s591_s13, 3  ;;  %vm183_vm0 = vcmask (!%p117_p9), 1044480   ;;  %vm158_vm1 = vcmask (!%p117_p9), 302080  }
   0xe   : > { %120 = sbr.rel (%p117_p9) target bundleno = 259 (0x103), region = 28  ;;  %v433_v3 = vpack.c.bf16 (!%p117_p9), %v154_v1, %v153_v0  ;;  %v156_v4 = vld [vmem:[%s700_s1 + $0x18] sm:$0xff] (!%p117_p9)  ;;  %p139_p10 = scmp.lt.s32.totalorder (!%p117_p9), %s381_s27, 15  ;;  %v157_v6 = vld [vmem:[%s700_s1 + $0x20] sm:$0x1f] (!%p117_p9) }
   0xf   : > { %v437_v5 = vpack.c.bf16 (!%p117_p9), %v156_v4, %v155_v2  ;;  %s135_s8 = sand.u32 (!%p117_p9), 1, %s542_s10   ;;  %s397_s21 = sshll.u32 (!%p117_p9), %s591_s13, 10 }
  0x10   : > { %434 = vmatprep.subr.bf16.mxu0 (!%p117_p9), %v433_v3  ;;  %441 = vmatprep.subr.bf16.mxu1 (!%p117_p9), %v433_v3  ;;  %s380_s14 = sshll.u32 (!%p117_p9), %s135_s8, 6  ;;  %s656_s24 = scalar_lea.hbm (!%p117_p9), %s701_s2, %s397_s21 }
  0x11   : > { %436 = vmatpush3.bf16.msra.mxu0 (!%p117_p9), %v433_v3  ;;  %444 = vmatpush3.bf16.msra.mxu1 (!%p117_p9), %v433_v3  ;;  %s137_s16 = scalar_lea.vmem (!%p117_p9), [#allocation2], %s380_s14  ;;  %s658_s13 = scalar_lea.sflag (!%p117_p9), [#allocation3], %s135_s8 }
  0x12   : > { %438 = vmatprep.subr.bf16.mxu0 (!%p117_p9), %v437_v5  ;;  %442 = vmatprep.subr.bf16.mxu1 (!%p117_p9), %v437_v5  ;;  %s314_s17 = sshll.u32 (!%p117_p9), %s137_s16, 4  ;;  %s552_s26 = smov (!%p117_p9), [#allocation2]   ;;  %s651_s17 = int_to_ptr.vmem [resolvable:$true] %s314_s17 }
  0x13   : > { %s488_s25 = scalar_lea.vmem (!%p117_p9), %s651_s17, 1024 }
  0x14   : > { %p489_p11 = scmp.ne.s32.totalorder (!%p117_p9), %s651_s17, %s488_s25 }
  0x15   : > { %s709_s27 = smov (!%p139_p10, %s381_s27), 15  ;;  %440 = vmatpush3.bf16.msra.mxu0 %v437_v5  ;;  %445 = vmatpush3.bf16.msra.mxu1 %v437_v5 }
  0x16   : > { %s382_s30 = sshll.u32 %s709_s27, 3  ;;  %419 = vmatprep.subr.msk.mxu0 %vm183_vm0, %v157_v6  ;;  %443 = vmatprep.subr.msk.mxu1 %vm183_vm0, %v157_v6  ;;  %p490_p12 = pnand %p489_p11, %p608_p5 }
  0x17   : > { %s142_s7 = scalar_lea.vmem %s699_s0, %s382_s30  ;;  %s492_s27 = sshll.u32 %s552_s26, 4  ;;  %s493_s27 = int_to_ptr.vmem [resolvable:$false] %s492_s27 }
  0x18   : > { %v145_v7 = vld [vmem:[%s142_s7] sm:$0xff]  ;;  %v146_v9 = vld [vmem:[%s142_s7 + $0x8] sm:$0xff]  ;;  %v147_v11 = vld [vmem:[%s142_s7 + $0x10] sm:$0xff]  ;;  %p491_p13 = pneg %p490_p12  ;;  %s494_s28 = scalar_lea.vmem %s493_s27, 2048 }
  0x19   : > { %v149_v8 = vld [vmem:[%s142_s7 + $0x20] sm:$0xff]  ;;  %421 = vmatprep.mubr.msk.f32.mxu0 %vm158_vm1, %v145_v7  ;;  %v150_v10 = vld [vmem:[%s142_s7 + $0x28] sm:$0xff]  ;;  %v151_v12 = vld [vmem:[%s142_s7 + $0x30] sm:$0xff]  ;;  %420 = vmatpush3.msk.msra.mxu0 %vm183_vm0, %v157_v6  ;;  %p495_p0 = scmp.lt.s32.totalorder %s651_s17, %s493_s27  ;;  %p496_p1 = scmp.lt.s32.totalorder %s494_s28, %s488_s25 }
  0x1a   : > { %427 = vmatprep.mubr.msk.f32.mxu1 %vm158_vm1, %v149_v8  ;;  %446 = vmatpush3.msk.msra.mxu1 %vm183_vm0, %v157_v6  ;;  %v148_v13 = vld [vmem:[%s142_s7 + $0x18] sm:$0xff] }
  0x1b   : > { %422 = vmatmul.mubr.msk.f32.vlgmr.msra.gmra.mrb[0].mxu0 %vm158_vm1, %v146_v9  ;;  %428 = vmatmul.mubr.msk.f32.vlgmr.msra.gmra.mrb[0].mxu1 %vm158_vm1, %v150_v10  ;;  %v152_v14 = vld [vmem:[%s142_s7 + $0x38] sm:$0xff]  ;;  %p497_p2 = por %p496_p1, %p495_p0 }
  0x1c   : > { %424 = vmatprep.mubr.msk.f32.mxu0 %vm158_vm1, %v147_v11  ;;  %430 = vmatprep.mubr.msk.f32.mxu1 %vm158_vm1, %v151_v12 }
  0x1d   : > { %p498_p3 = pnand %p497_p2, %p491_p13 }
  0x1f   : > { %425 = vmatmul.mubr.msk.f32.gmra.mrb[2].mxu0 %vm158_vm1, %v148_v13  ;;  %431 = vmatmul.mubr.msk.f32.gmra.mrb[2].mxu1 %vm158_vm1, %v152_v14 }
  0xee   : > { %v423_v15 = vpop.f32.mrb[0].mxu0  ;;  %v429_v16 = vpop.f32.mrb[0].mxu1 }
  0xef   : > { %293 = vst [vmem:[%s137_s16 + $0x8] sm:$0xff] %v423_v15  ;;  %297 = vst [vmem:[%s137_s16 + $0x28] sm:$0xff] %v429_v16  ;;  %v253_v17 = vpop.f32.mrb[1].mxu0  ;;  %v273_v18 = vpop.f32.mrb[1].mxu1 }
  0xf0   : > { %292 = vst [vmem:[%s137_s16] sm:$0xff] %v253_v17  ;;  %296 = vst [vmem:[%s137_s16 + $0x20] sm:$0xff] %v273_v18 }
  0xf2   : > { %v426_v19 = vpop.f32.mrb[2].mxu0  ;;  %v432_v20 = vpop.f32.mrb[2].mxu1 }
  0xf3   : > { %295 = vst [vmem:[%s137_s16 + $0x18] sm:$0xff] %v426_v19  ;;  %299 = vst [vmem:[%s137_s16 + $0x38] sm:$0xff] %v432_v20  ;;  %v263_v21 = vpop.f32.mrb[3].mxu0  ;;  %v283_v22 = vpop.f32.mrb[3].mxu1 }
  0xf4   : > { %294 = vst [vmem:[%s137_s16 + $0x10] sm:$0xff] %v263_v21  ;;  %298 = vst [vmem:[%s137_s16 + $0x30] sm:$0xff] %v283_v22 }
  0xf5   : > { %501 = shalt.err (!%p498_p3)
}
  0xf6   : > { %s502_s29 = scalar_lea.hbm %s656_s24, 1024  ;;  %s506_s4 = scalar_lea.hbm %s701_s2, 2048 }
  0xf7   : > { %p503_p4 = scmp.ne.s32.totalorder %s656_s24, %s502_s29  ;;  %p507_p9 = scmp.lt.u32.totalorder %s656_s24, %s701_s2 }
  0xf8   : > { %p508_p10 = scmp.lt.u32.totalorder %s506_s4, %s502_s29  ;;  %p510_p12 = scmp.lt.u32.totalorder %s502_s29, %s656_s24 }
  0xf9   : > { %p504_p7 = pnand %p503_p4, %p608_p5 }
  0xfa   : > { %p509_p11 = por %p508_p10, %p507_p9 }
  0xfb   : > { %p505_p8 = pneg %p504_p7 }
  0xfc   : > { %p511_p13 = por %p510_p12, %p509_p11 }
  0xfe   : > { %p512_p0 = pnand %p511_p13, %p505_p8 }
 0x100   : > { %515 = shalt.err (!%p512_p0)
}
 0x101   : > { %s553_s7 = smov 128   ;;  %s554_s8 = smov 8  }
 0x102   : > { %447 = dma.vmem_to_hbm [thread:$0]  (%p608_p5), %s651_s17, 1024, %s656_s24, %s658_s13, %s553_s7, %s553_s7, %s554_s8  }
 0x103 PF: > { %p453_p1 = scmp.ge.s32.totalorder %s550_s12, 2  ;;  %s329_s14 = sand.u32 1, %s538_s9  }
 0x104   : > { %s330_s16 = scalar_lea.sflag [#allocation3], %s329_s14 }
 0x105   : > { %p450_p2 = pnand %p453_p1, %p612_p6 }
 0x107   : > { %533 = dma.done.wait (!%p450_p2), %s330_s16, 1024  }
 0x108   : > { %535 = vsyncadd (!%p450_p2), %s330_s16, 4294966272  ;;  %p12_p3 = scmp.ge.s32.totalorder %s595_s15, 4   ;;  %s704_s9 = smov %s542_s10 }
 0x109   : > { %s705_s10 = smov %s546_s11  ;;  %s706_s11 = smov %s606_s18 }
 0x10a   : > { %s707_s12 = smov %s595_s15  ;;  %14 = sbr.rel (!%p12_p3) target bundleno = 3 (0x3), region = 63 }
 0x111   :  { %335 = vsyncpa [#allocation3], 1 }
 0x112   :  { %337 = vsyncpa [#allocation3 + $0x1], 1 }

</bundles_post_ra>
